<compile_context>
chip_gen: v6e
topology: v6e:2x2x1
jax: 0.10.0
libtpu: 0.0.40
codegen_flags: <defaults>
</compile_context>

<pallas_src>
import math

import jax
import jax.numpy as jnp
from jax.experimental import pallas as pl
from jax.experimental.pallas import tpu as pltpu


_INV_SQRT2 = 1.0 / 1.41421  # multiply by reciprocal instead of dividing (VALU mul)


def _round_up(x, m):
    return ((x + m - 1) // m) * m


# ----------------------------------------------------------------------------
# LM prediction head kernel: one (tm, tv) output tile per grid step.
# grid = (row_tiles, vocab_tiles); vocab is the inner ("arbitrary") axis so the
# hn scratch written at j == 0 is valid for every subsequent vocab tile of the
# same row tile.
# ----------------------------------------------------------------------------
def lm_head_kernel(x_ref, wt_ref, bt_ref, gamma_ref, beta_ref,
                   dec_wt_ref, dec_b_ref, out_ref, hn_ref):
    j = pl.program_id(1)

    @pl.when(j == 0)
    def _():
        # dense (F.linear without bias) on the MXU, bf16 x bf16 -> f32 acc.
        y = jnp.dot(x_ref[...], wt_ref[...], preferred_element_type=jnp.float32)
        # fused bias_gelu:  (b + y) * 0.5 * (1 + erf((b + y) / 1.41421))
        h = y + bt_ref[...]
        h = h * 0.5 * (1.0 + jax.lax.erf(h * _INV_SQRT2))
        # BertLayerNorm: biased variance, eps = 1e-12, f32 math on VPU/EUP.
        mu = jnp.mean(h, axis=-1, keepdims=True)
        d = h - mu
        var = jnp.mean(d * d, axis=-1, keepdims=True)
        hn = d * jax.lax.rsqrt(var + 1e-12)
        hn = hn * gamma_ref[...] + beta_ref[...]
        hn_ref[...] = hn.astype(hn_ref.dtype)

    # decoder tile: (tm, H) @ (H, tv) on the MXU, f32 accumulation + bias.
    scores = jnp.dot(hn_ref[...], dec_wt_ref[...],
                     preferred_element_type=jnp.float32)
    out_ref[...] = (scores + dec_b_ref[...]).astype(out_ref.dtype)


def bert_pretraining_heads(sequence_output, pooled_output, params, *,
                           tm=256, tv=512, compute_dtype=jnp.bfloat16):
    """sequence_output: [B, S, H] f32, pooled_output: [B, H] f32.

    Tile budget (per perf review):
      v6e : tm=256, tv=512-2048 fits easily in 128 MiB VMEM.
      v7x : 64 MiB VMEM -> keep tv <= 1024 with bf16 weights (defaults here use
            ~5 MiB at H=768); the parallel row axis feeds both TensorCores.
      v5e : prefer tm=128-256, tv=512-1024 so the (tm, tv) writeback stays
            pipelined behind the single vst slot / ~820 GB/s HBM.
    """
    B, S, H = sequence_output.shape
    V = params["decoder_wt"].shape[1]
    M = B * S

    # Cap tiles for small problems, keep sublane (16 for bf16) / lane (128)
    # alignment, then pad M and V up to the tile grid.
    tm = min(tm, _round_up(M, 16))
    tv = _round_up(min(tv, _round_up(V, 128)), 128)
    M_pad = _round_up(M, tm)
    V_pad = _round_up(V, tv)

    x = sequence_output.reshape(M, H).astype(compute_dtype)
    if M_pad != M:
        x = jnp.pad(x, ((0, M_pad - M), (0, 0)))

    dense_wt = params["dense_wt"].astype(compute_dtype)   # (H, H)  W^T
    dec_wt = params["decoder_wt"].astype(compute_dtype)   # (H, V)  E^T
    dec_b = params["decoder_b"]                           # (1, V)  f32
    if V_pad != V:
        dec_wt = jnp.pad(dec_wt, ((0, 0), (0, V_pad - V)))
        dec_b = jnp.pad(dec_b, ((0, 0), (0, V_pad - V)))

    grid = (M_pad // tm, V_pad // tv)

    lm = pl.pallas_call(
        lm_head_kernel,
        out_shape=jax.ShapeDtypeStruct((M_pad, V_pad), jnp.float32),
        grid_spec=pltpu.PrefetchScalarGridSpec(
            num_scalar_prefetch=0,
            grid=grid,
            in_specs=[
                # x rows: changes with i only (re-DMA'd only when i changes).
                pl.BlockSpec((tm, H), lambda i, j: (i, 0)),
                # Constant-index weight/param blocks: single-buffered.
                pl.BlockSpec((H, H), lambda i, j: (0, 0),
                             pipeline_mode=pl.Buffered(1)),   # dense W^T
                pl.BlockSpec((1, H), lambda i, j: (0, 0),
                             pipeline_mode=pl.Buffered(1)),   # dense bias
                pl.BlockSpec((1, H), lambda i, j: (0, 0),
                             pipeline_mode=pl.Buffered(1)),   # LN gamma
                pl.BlockSpec((1, H), lambda i, j: (0, 0),
                             pipeline_mode=pl.Buffered(1)),   # LN beta
                # Decoder weight / bias tiles: stream over the vocab axis.
                pl.BlockSpec((H, tv), lambda i, j: (0, j)),
                pl.BlockSpec((1, tv), lambda i, j: (0, j)),
            ],
            out_specs=pl.BlockSpec((tm, tv), lambda i, j: (i, j)),
            scratch_shapes=[pltpu.VMEM((tm, H), compute_dtype)],  # hn reuse
        ),
        compiler_params=pltpu.CompilerParams(
            dimension_semantics=("parallel", "arbitrary"),
            vmem_limit_bytes=64 * 1024 * 1024,
        ),
    )(x, dense_wt, params["dense_b"], params["ln_gamma"], params["ln_beta"],
      dec_wt, dec_b)

    prediction_scores = lm[:M, :V].reshape(B, S, V)

    # NSP head: (B, 2) output -> last dim far below 128 lanes; a Pallas kernel
    # would be pure masked-store + launch overhead, so let XLA fuse it.
    seq_relationship_score = (
        pooled_output @ params["seq_rel_wt"] + params["seq_rel_b"][0])

    return prediction_scores, seq_relationship_score


# ----------------------------------------------------------------------------
# Pure-JAX references for sanity checks.
# ----------------------------------------------------------------------------
def reference(sequence_output, pooled_output, params, *,
              compute_dtype=jnp.bfloat16):
    """Same math; matmul operands cast the same way as the kernel."""
    x = sequence_output.astype(compute_dtype)
    w = params["dense_wt"].astype(compute_dtype)
    h = jnp.dot(x, w, preferred_element_type=jnp.float32) + params["dense_b"][0]
    h = h * 0.5 * (1.0 + jax.lax.erf(h / 1.41421))
    mu = jnp.mean(h, axis=-1, keepdims=True)
    var = jnp.mean((h - mu) ** 2, axis=-1, keepdims=True)
    h = (h - mu) * jax.lax.rsqrt(var + 1e-12)
    h = h * params["ln_gamma"][0] + params["ln_beta"][0]
    pred = jnp.dot(h.astype(compute_dtype),
                   params["decoder_wt"].astype(compute_dtype),
                   preferred_element_type=jnp.float32) + params["decoder_b"][0]
    nsp = pooled_output @ params["seq_rel_wt"] + params["seq_rel_b"][0]
    return pred, nsp


def make_params(key, H, V):
    ks = jax.random.split(key, 8)
    init = 0.02  # config['initializer_range']
    # transform dense: torch Linear weight (H, H); store W^T so kernel does x @ W^T
    dense_w = jax.random.normal(ks[0], (H, H), jnp.float32) * init
    dense_b = jax.random.normal(ks[1], (1, H), jnp.float32) * init
    ln_gamma = jnp.ones((1, H), jnp.float32)
    ln_beta = jnp.zeros((1, H), jnp.float32)
    # shared embedding weights E: (V, H); decoder uses E as weight -> x @ E^T
    emb = jax.random.normal(ks[2], (V, H), jnp.float32) * init
    decoder_b = jnp.zeros((1, V), jnp.float32)           # nn.Parameter(torch.zeros(V))
    # seq_relationship: Linear(H, 2)
    bound = 1.0 / math.sqrt(H)
    seq_w = jax.random.uniform(ks[3], (2, H), jnp.float32, -bound, bound)
    seq_b = jax.random.uniform(ks[4], (1, 2), jnp.float32, -bound, bound)
    return {
        "dense_wt": dense_w.T,        # (H, H)
        "dense_b": dense_b,           # (1, H)
        "ln_gamma": ln_gamma,
        "ln_beta": ln_beta,
        "decoder_wt": emb.T,          # (H, V)
        "decoder_b": decoder_b,       # (1, V)
        "seq_rel_wt": seq_w.T,        # (H, 2)
        "seq_rel_b": seq_b,           # (1, 2)
    }


if __name__ == "__main__":
    # Small shapes that still exercise the real structure:
    #   M = 80 rows -> padded to 96 with tm=32 (3 row tiles),
    #   V = 320     -> padded to 384 with tv=128 (3 vocab tiles),
    #   i.e. a genuine 3x3 grid with the hn scratch reused across vocab tiles.
    B, S, H, V = 2, 40, 128, 320
    key = jax.random.PRNGKey(0)
    k_seq, k_pool, k_par = jax.random.split(key, 3)

    sequence_output = jax.random.normal(k_seq, (B, S, H), jnp.float32)
    pooled_output = jax.random.normal(k_pool, (B, H), jnp.float32)
    params = make_params(k_par, H, V)

    pred, nsp = bert_pretraining_heads(sequence_output, pooled_output, params,
                                       tm=32, tv=128)
    pred, nsp = jax.block_until_ready((pred, nsp))
    assert pred.shape == (B, S, V) and nsp.shape == (B, 2)

    # vs reference using the same bf16 matmul operands (tight).
    pred_ref, nsp_ref = reference(sequence_output, pooled_output, params)
    assert jnp.allclose(pred, pred_ref, atol=5e-3, rtol=5e-3), \
        float(jnp.max(jnp.abs(pred - pred_ref)))
    assert jnp.allclose(nsp, nsp_ref, atol=1e-5, rtol=1e-5)

    # vs pure-f32 reference (bounds the bf16 matmul error budget).
    pred_f32, nsp_f32 = reference(sequence_output, pooled_output, params,
                                  compute_dtype=jnp.float32)
    assert jnp.allclose(pred, pred_f32, atol=3e-2, rtol=3e-2), \
        float(jnp.max(jnp.abs(pred - pred_f32)))
    assert jnp.allclose(nsp, nsp_f32, atol=1e-5, rtol=1e-5)

    print("KERNEL_OK")
</pallas_src>

<mosaic_0001>
module attributes {stable_mosaic.version = 11 : i64} {
  func.func @lm_head_kernel(%arg0: i32, %arg1: i32, %arg2: memref<32x128xbf16, #tpu.memory_space<vmem>>, %arg3: memref<128x128xbf16, #tpu.memory_space<vmem>>, %arg4: memref<1x128xf32, #tpu.memory_space<vmem>>, %arg5: memref<1x128xf32, #tpu.memory_space<vmem>>, %arg6: memref<1x128xf32, #tpu.memory_space<vmem>>, %arg7: memref<128x128xbf16, #tpu.memory_space<vmem>>, %arg8: memref<1x128xf32, #tpu.memory_space<vmem>>, %arg9: memref<32x128xf32, #tpu.memory_space<vmem>>, %arg10: memref<32x128xbf16, #tpu.memory_space<vmem>>) attributes {dimension_semantics = [#tpu.dimension_semantics<parallel>, #tpu.dimension_semantics<arbitrary>], iteration_bounds = array<i64: 3, 3>, scalar_prefetch = 0 : i64, scratch_operands = 1 : i64, tpu.core_type = #tpu.core_type<tc>, window_params = [{transform_indices = @transform_0, window_bounds = array<i64: 32, 128>}, {pipeline_mode = #tpu.pipeline_mode<synchronous>, transform_indices = @transform_1, window_bounds = array<i64: 128, 128>}, {pipeline_mode = #tpu.pipeline_mode<synchronous>, transform_indices = @transform_2, window_bounds = array<i64: 1, 128>}, {pipeline_mode = #tpu.pipeline_mode<synchronous>, transform_indices = @transform_3, window_bounds = array<i64: 1, 128>}, {pipeline_mode = #tpu.pipeline_mode<synchronous>, transform_indices = @transform_4, window_bounds = array<i64: 1, 128>}, {transform_indices = @transform_5, window_bounds = array<i64: 128, 128>}, {transform_indices = @transform_6, window_bounds = array<i64: 1, 128>}, {transform_indices = @transform_7, window_bounds = array<i64: 32, 128>}]} {
    %c0_i32 = arith.constant 0 : i32
    %0 = arith.cmpi eq, %arg1, %c0_i32 : i32
    %1 = arith.extui %0 : i1 to i32
    %c0_i32_0 = arith.constant 0 : i32
    %2 = arith.cmpi ne, %1, %c0_i32_0 : i32
    scf.if %2 {
      %c0_8 = arith.constant 0 : index
      %c0_9 = arith.constant 0 : index
      %10 = vector.load %arg2[%c0_8, %c0_9] : memref<32x128xbf16, #tpu.memory_space<vmem>>, vector<32x128xbf16>
      %c0_10 = arith.constant 0 : index
      %c0_11 = arith.constant 0 : index
      %11 = vector.load %arg3[%c0_10, %c0_11] : memref<128x128xbf16, #tpu.memory_space<vmem>>, vector<128x128xbf16>
      %cst_12 = arith.constant dense<0.000000e+00> : vector<32x128xf32>
      %12 = tpu.matmul %10, %11, %cst_12 {dimension_numbers = #tpu.dot_dimension_numbers<[1], [0], [0], [1], [0, 0, 1, 1], [], []>} : vector<32x128xbf16>, vector<128x128xbf16>, vector<32x128xf32> -> vector<32x128xf32>
      %c0_13 = arith.constant 0 : index
      %c0_14 = arith.constant 0 : index
      %13 = vector.load %arg4[%c0_13, %c0_14] : memref<1x128xf32, #tpu.memory_space<vmem>>, vector<1x128xf32>
      %14 = vector.broadcast %13 : vector<1x128xf32> to vector<32x128xf32>
      %15 = arith.addf %12, %14 : vector<32x128xf32>
      %cst_15 = arith.constant 5.000000e-01 : f32
      %16 = vector.broadcast %cst_15 : f32 to vector<32x128xf32>
      %17 = arith.mulf %15, %16 : vector<32x128xf32>
      %cst_16 = arith.constant 0.707108557 : f32
      %18 = vector.broadcast %cst_16 : f32 to vector<32x128xf32>
      %19 = arith.mulf %15, %18 : vector<32x128xf32>
      %20 = math.erf %19 : vector<32x128xf32>
      %cst_17 = arith.constant 1.000000e+00 : f32
      %21 = vector.broadcast %cst_17 : f32 to vector<32x128xf32>
      %22 = arith.addf %21, %20 : vector<32x128xf32>
      %23 = arith.mulf %17, %22 : vector<32x128xf32>
      %cst_18 = arith.constant dense<0.000000e+00> : vector<32xf32>
      %24 = vector.multi_reduction <add>, %23, %cst_18 [1] : vector<32x128xf32> to vector<32xf32>
      %25 = vector.shape_cast %24 : vector<32xf32> to vector<32x1xf32>
      %cst_19 = arith.constant 1.280000e+02 : f32
      %26 = vector.broadcast %cst_19 : f32 to vector<32x1xf32>
      %27 = arith.divf %25, %26 : vector<32x1xf32>
      %28 = vector.broadcast %27 : vector<32x1xf32> to vector<32x128xf32>
      %29 = arith.subf %23, %28 : vector<32x128xf32>
      %30 = arith.mulf %29, %29 : vector<32x128xf32>
      %cst_20 = arith.constant dense<0.000000e+00> : vector<32xf32>
      %31 = vector.multi_reduction <add>, %30, %cst_20 [1] : vector<32x128xf32> to vector<32xf32>
      %32 = vector.shape_cast %31 : vector<32xf32> to vector<32x1xf32>
      %cst_21 = arith.constant 1.280000e+02 : f32
      %33 = vector.broadcast %cst_21 : f32 to vector<32x1xf32>
      %34 = arith.divf %32, %33 : vector<32x1xf32>
      %cst_22 = arith.constant 9.99999996E-13 : f32
      %35 = vector.broadcast %cst_22 : f32 to vector<32x1xf32>
      %36 = arith.addf %34, %35 : vector<32x1xf32>
      %37 = math.rsqrt %36 : vector<32x1xf32>
      %38 = vector.broadcast %37 : vector<32x1xf32> to vector<32x128xf32>
      %39 = arith.mulf %29, %38 : vector<32x128xf32>
      %c0_23 = arith.constant 0 : index
      %c0_24 = arith.constant 0 : index
      %40 = vector.load %arg5[%c0_23, %c0_24] : memref<1x128xf32, #tpu.memory_space<vmem>>, vector<1x128xf32>
      %41 = vector.broadcast %40 : vector<1x128xf32> to vector<32x128xf32>
      %42 = arith.mulf %39, %41 : vector<32x128xf32>
      %c0_25 = arith.constant 0 : index
      %c0_26 = arith.constant 0 : index
      %43 = vector.load %arg6[%c0_25, %c0_26] : memref<1x128xf32, #tpu.memory_space<vmem>>, vector<1x128xf32>
      %44 = vector.broadcast %43 : vector<1x128xf32> to vector<32x128xf32>
      %45 = arith.addf %42, %44 : vector<32x128xf32>
      %46 = arith.truncf %45 : vector<32x128xf32> to vector<32x128xbf16>
      %c0_27 = arith.constant 0 : index
      %c0_28 = arith.constant 0 : index
      %47 = vector.load %arg10[%c0_27, %c0_28] : memref<32x128xbf16, #tpu.memory_space<vmem>>, vector<32x128xbf16>
      tpu.vector_store %arg10[%c0_27, %c0_28], %46 {strides = array<i32>} : memref<32x128xbf16, #tpu.memory_space<vmem>>, vector<32x128xbf16>,
    } else {
    }
    %c0 = arith.constant 0 : index
    %c0_1 = arith.constant 0 : index
    %3 = vector.load %arg10[%c0, %c0_1] : memref<32x128xbf16, #tpu.memory_space<vmem>>, vector<32x128xbf16>
    %c0_2 = arith.constant 0 : index
    %c0_3 = arith.constant 0 : index
    %4 = vector.load %arg7[%c0_2, %c0_3] : memref<128x128xbf16, #tpu.memory_space<vmem>>, vector<128x128xbf16>
    %cst = arith.constant dense<0.000000e+00> : vector<32x128xf32>
    %5 = tpu.matmul %3, %4, %cst {dimension_numbers = #tpu.dot_dimension_numbers<[1], [0], [0], [1], [0, 0, 1, 1], [], []>} : vector<32x128xbf16>, vector<128x128xbf16>, vector<32x128xf32> -> vector<32x128xf32>
    %c0_4 = arith.constant 0 : index
    %c0_5 = arith.constant 0 : index
    %6 = vector.load %arg8[%c0_4, %c0_5] : memref<1x128xf32, #tpu.memory_space<vmem>>, vector<1x128xf32>
    %7 = vector.broadcast %6 : vector<1x128xf32> to vector<32x128xf32>
    %8 = arith.addf %5, %7 : vector<32x128xf32>
    %c0_6 = arith.constant 0 : index
    %c0_7 = arith.constant 0 : index
    %9 = vector.load %arg9[%c0_6, %c0_7] : memref<32x128xf32, #tpu.memory_space<vmem>>, vector<32x128xf32>
    tpu.vector_store %arg9[%c0_6, %c0_7], %8 {strides = array<i32>} : memref<32x128xf32, #tpu.memory_space<vmem>>, vector<32x128xf32>,
    return
  }
  func.func @transform_0(%arg0: i32, %arg1: i32) -> (i32, i32) {
    %c0_i32 = arith.constant 0 : i32
    %c0_i32_0 = arith.constant 0 : i32
    return %arg0, %c0_i32 : i32, i32
  }
  func.func @transform_1(%arg0: i32, %arg1: i32) -> (i32, i32) {
    %c0_i32 = arith.constant 0 : i32
    %c0_i32_0 = arith.constant 0 : i32
    %c0_i32_1 = arith.constant 0 : i32
    return %c0_i32, %c0_i32_0 : i32, i32
  }
  func.func @transform_2(%arg0: i32, %arg1: i32) -> (i32, i32) {
    %c0_i32 = arith.constant 0 : i32
    %c0_i32_0 = arith.constant 0 : i32
    %c0_i32_1 = arith.constant 0 : i32
    return %c0_i32, %c0_i32_0 : i32, i32
  }
  func.func @transform_3(%arg0: i32, %arg1: i32) -> (i32, i32) {
    %c0_i32 = arith.constant 0 : i32
    %c0_i32_0 = arith.constant 0 : i32
    %c0_i32_1 = arith.constant 0 : i32
    return %c0_i32, %c0_i32_0 : i32, i32
  }
  func.func @transform_4(%arg0: i32, %arg1: i32) -> (i32, i32) {
    %c0_i32 = arith.constant 0 : i32
    %c0_i32_0 = arith.constant 0 : i32
    %c0_i32_1 = arith.constant 0 : i32
    return %c0_i32, %c0_i32_0 : i32, i32
  }
  func.func @transform_5(%arg0: i32, %arg1: i32) -> (i32, i32) {
    %c0_i32 = arith.constant 0 : i32
    %c0_i32_0 = arith.constant 0 : i32
    return %c0_i32, %arg1 : i32, i32
  }
  func.func @transform_6(%arg0: i32, %arg1: i32) -> (i32, i32) {
    %c0_i32 = arith.constant 0 : i32
    %c0_i32_0 = arith.constant 0 : i32
    return %c0_i32, %arg1 : i32, i32
  }
  func.func @transform_7(%arg0: i32, %arg1: i32) -> (i32, i32) {
    %c0_i32 = arith.constant 0 : i32
    return %arg0, %arg1 : i32, i32
  }
}

</mosaic_0001>

<bundles_post_ra>
// kernel: tpu_custom_call.1
= control target key start
LH: loop header
LB: loop body
LE: loop exit
PB: predicated region body
PF: predicated region fallthrough
CT: control target
= control target key end

     0   :  { %s1879_s0 = inlined_call_operand.hbm [shape: bf16[96,128], index: 0, kind: input, shape index: {}]   ;;  %s1880_s1 = inlined_call_operand.hbm [shape: bf16[128,128], index: 1, kind: input, shape index: {}]   ;;  %s1881_s2 = inlined_call_operand.vmem [shape: f32[1,128], index: 2, kind: input, shape index: {}]   ;;  %s1882_s3 = inlined_call_operand.vmem [shape: f32[1,128], index: 3, kind: input, shape index: {}]   ;;  %s1883_s4 = inlined_call_operand.vmem [shape: f32[1,128], index: 4, kind: input, shape index: {}]   ;;  %s1884_s5 = inlined_call_operand.hbm [shape: bf16[128,384], index: 5, kind: input, shape index: {}]   ;;  %s1885_s6 = inlined_call_operand.vmem [shape: f32[1,384], index: 6, kind: input, shape index: {}]   ;;  %s1886_s7 = inlined_call_operand.hbm [shape: f32[96,384], index: 7, kind: output, shape index: {}]  }
   0x1   :  { %1899 = sst [smem:[#allocation21_spill]] %s1879_s0 }
   0x2   :  { %1900 = sst [smem:[#allocation22_spill]] %s1880_s1 }
   0x3   :  { %1901 = sst [smem:[#allocation23_spill]] %s1881_s2 }
   0x4   :  { %1902 = sst [smem:[#allocation24_spill]] %s1882_s3 }
   0x5   :  { %1903 = sst [smem:[#allocation25_spill]] %s1883_s4 }
   0x6   :  { %1904 = sst [smem:[#allocation26_spill]] %s1884_s5 }
   0x7   :  { %1905 = sst [smem:[#allocation27_spill]] %s1885_s6 }
   0x8   :  { %1906 = sst [smem:[#allocation28_spill]] %s1886_s7 }
   0x9   :  { %12 = vsyncpa [#allocation4], 0 }
   0xa   :  { %14 = vsyncpa [#allocation4 + $0x1], 0 }
   0xb   :  { %15 = vsyncpa [#allocation7], 0 }
   0xc   :  { %16 = vsyncpa [#allocation5], 0 }
   0xd   :  { %18 = vsyncpa [#allocation5 + $0x1], 0  ;;  %s1504_s24 = smov 0   ;;  %s1506_s25 = smov 0  }
   0xe   :  { %s1508_s26 = smov 0   ;;  %s1510_s27 = smov 0  }
   0xf   :  { %s1512_s28 = smov 0   ;;  %s1514_s29 = smov 0  }
  0x10   :  { %s1516_s30 = smov 0   ;;  %s1518_s8 = smov 0  }
  0x11   :  { %s1520_s9 = smov 0   ;;  %s1522_s10 = smov 0  }
  0x12   :  { %s1524_s11 = smov 0   ;;  %s1526_s12 = smov 0  }
  0x13   :  { %s1528_s13 = smov 0   ;;  %s1530_s14 = smov 0  }
  0x14 LB: > { %1907 = sst [smem:[#allocation14_spill]] %s1436_s10  ;;  %s33_s15 = sadd.s32 1, %s1444_s12  ;;  %s1452_s14 = sphi %s1530_s14, %s24_s14   ;;  %s1448_s13 = sphi %s1528_s13, %s1947_s13   ;;  %s1444_s12 = sphi %s1526_s12, %s1946_s12   ;;  %s1440_s11 = sphi %s1524_s11, %s1945_s11   ;;  %s1436_s10 = sphi %s1522_s10, %s1944_s10   ;;  %s1432_s9 = sphi %s1520_s9, %s1956_s9   ;;  %s1428_s8 = sphi %s1518_s8, %s1955_s8   ;;  %s1424_s30 = sphi %s1516_s30, %s1954_s30   ;;  %s1420_s29 = sphi %s1514_s29, %s1953_s29   ;;  %s1416_s28 = sphi %s1512_s28, %s1952_s28   ;;  %s1412_s27 = sphi %s1510_s27, %s1951_s27   ;;  %s1408_s26 = sphi %s1508_s26, %s1950_s26   ;;  %s1404_s25 = sphi %s1506_s25, %s1949_s25   ;;  %s1400_s24 = sphi %s1504_s24, %s1948_s24  }
  0x15   : > { %1908 = sst [smem:[#allocation15_spill]] %s1440_s11  ;;  %s36_s16 = sadd.s32 1, %s1448_s13 }
  0x16   : > { %1909 = sst [smem:[#allocation16_spill]] %s1444_s12  ;;  %p34_p0 = scmp.ge.s32.totalorder %s33_s15, 3 }
  0x17   : > { %1910 = sst [smem:[#allocation17_spill]] %s1448_s13  ;;  %s43_s17 = sadd.s32 1, %s1432_s9 }
  0x18   : > { %p50_p1 = scmp.ne.s32.totalorder %s1432_s9, %s1428_s8  ;;  %p51_p2 = scmp.eq.s32.totalorder %s1452_s14, 0 }
  0x19   : > { %s1958_s15 = smov (%p34_p0, %s33_s15), 0  ;;  %s1960_s16 = smov (!%p34_p0, %s36_s16), %s1448_s13 }
  0x1a   : > { %1911 = sst [smem:[#allocation18_spill]] %s1958_s15  ;;  %p1585_p3 = por %p51_p2, %p50_p1 }
  0x1b   : > { %s1591_s19 = ssub.s32 %s1444_s12, %s1958_s15  ;;  %p38_p4 = scmp.ge.s32.totalorder %s1960_s16, 3 }
  0x1c   : > { %p151_p5 = scmp.eq.s32.totalorder %s1591_s19, 0  ;;  %s207_s20 = sadd.s32 1, %s1408_s26 }
  0x1d   : > { %s1962_s16 = smov (%p38_p4, %s1960_s16), 0  ;;  %p1060_p6 = scmp.lt.s32.totalorder %s1452_s14, 9 }
  0x1e   : > { %1913 = sst [smem:[#allocation19_spill]] %s1962_s16  ;;  %s40_s21 = ssub.s32 %s1448_s13, %s1962_s16 }
  0x1f   : > { %p41_p7 = scmp.eq.s32.totalorder %s40_s21, 0  ;;  %s204_s22 = sor.u32 %s1591_s19, %s40_s21 }
  0x20   : > { %p205_p8 = scmp.eq.s32.totalorder %s204_s22, 0  ;;  %s266_s23 = sand.u32 1, %s1452_s14  }
  0x21   : > { %s1603_s7 = scalar_select %p41_p7, %s1432_s9, %s43_s17  }
  0x22   : > { %s1606_s15 = scalar_select %p205_p8, %s1408_s26, %s207_s20  }
  0x23   : > { %1914 = sst [smem:[#allocation20_spill]] %s1603_s7  ;;  %s268_s11 = sand.u32 1, %s1432_s9  }
  0x24   : > { %s912_s4 = sshll.u32 %s268_s11, 4  ;;  %s957_s3 = sshll.u32 %s1448_s13, 8 }
  0x25   : > { %s1915_s0 = sld [smem:[#allocation21_spill]]  ;;  %s270_s1 = scalar_lea.vmem [#allocation3], %s912_s4 }
  0x26   : > { %s277_s5 = sshll.u32 %s270_s1, 4  ;;  %p1617_p9 = pnand %p1060_p6, %p1585_p3  ;;  %s278_s5 = int_to_ptr.vmem [resolvable:$true] %s277_s5 }
  0x27   : > { %s1621_s17 = scalar_lea.sflag [#allocation4], %s266_s23  ;;  %s1231_s11 = scalar_lea.vmem %s278_s5, 256 }
  0x28   : > { %p1220_p10 = pneg %p1617_p9  ;;  %p1232_p11 = scmp.ne.s32.totalorder %s278_s5, %s1231_s11 }
  0x29   : > { %s1454_s2 = smov [#allocation3]  }
  0x2a   : > { %p1234_p12 = pnand %p1232_p11, %p1220_p10 }
  0x2b   : > { %s276_s10 = scalar_lea.hbm %s1915_s0, %s957_s3  ;;  %s1236_s3 = sshll.u32 %s1454_s2, 4  ;;  %s1237_s3 = int_to_ptr.vmem [resolvable:$false] %s1236_s3 }
  0x2c   : > { %p1235_p13 = pneg %p1234_p12  ;;  %s1238_s1 = scalar_lea.vmem %s1237_s3, 512 }
  0x2d   : > { %p1239_p0 = scmp.lt.s32.totalorder %s278_s5, %s1237_s3  ;;  %p1240_p1 = scmp.lt.s32.totalorder %s1238_s1, %s1231_s11 }
  0x2f   : > { %p1241_p3 = por %p1240_p1, %p1239_p0 }
  0x31   : > { %p1242_p4 = pnand %p1241_p3, %p1235_p13 }
  0x33   : > { %1245 = shalt.err (!%p1242_p4)
}
  0x34   : > { %s1891_s4 = smov 64   ;;  %s1893_s6 = smov 4  }
  0x35   : > { %1051 = dma.hbm_to_vmem [thread:$0]  (!%p1617_p9), %s276_s10, 256, %s278_s5, %s1621_s17, %s1891_s4, %s1891_s4, %s1893_s6  }
  0x36   : > { %s1632_s18 = sadd.s32 4294967295, %s1452_s14   ;;  %s908_s20 = sadd.s32 4294967294, %s1452_s14  }
  0x37   : > { %p56_p7 = scmp.ne.s32.totalorder %s1428_s8, %s1424_s30  ;;  %p1896_p8 = scmp.eq.s32.totalorder %s1632_s18, 0 }
  0x38   : > { %s153_s21 = sadd.s32 1, %s1420_s29  ;;  %p160_p10 = scmp.ne.s32.totalorder %s1420_s29, %s1416_s28 }
  0x39   : > { %p1643_p11 = por %p1896_p8, %p56_p7  ;;  %p166_p12 = scmp.ne.s32.totalorder %s1416_s28, %s1412_s27 }
  0x3a   : > { %s1652_s5 = scalar_select %p151_p5, %s1420_s29, %s153_s21  }
  0x3b   : > { %p1656_p9 = por %p160_p10, %p51_p2  ;;  %p1662_p13 = por %p166_p12, %p1896_p8 }
  0x3c   : > { %p217_p0 = scmp.ne.s32.totalorder %s1408_s26, %s1404_s25  ;;  %p218_p1 = scmp.eq.s32.totalorder %s1632_s18, 8 }
  0x3d   : > { %p223_p3 = scmp.ne.s32.totalorder %s1404_s25, %s1400_s24  ;;  %p224_p4 = scmp.eq.s32.totalorder %s908_s20, 8 }
  0x3e   : > { %p1671_p5 = por %p218_p1, %p217_p0  ;;  %p909_p2 = scmp.ge.s32.totalorder %s1452_s14, 1 }
  0x3f   : > { %p1676_p7 = por %p224_p4, %p223_p3  ;;  %p231_p10 = scmp.lt.s32.totalorder %s1452_s14, 10 }
  0x40   : > { %s1920_s27 = scalar_select %p1671_p5, 1, 0 }
  0x41   : > { %s1921_s19 = scalar_select %p1676_p7, 1, 0 }
  0x42   : > { %p1681_p12 = pnand %p909_p2, %p231_p10  ;;  %s1457_s23 = smov [#allocation6]  }
  0x43   : > { %s243_s11 = sshll.u32 %s1457_s23, 4  ;;  %p1689_p0 = pnand %p1060_p6, %p1656_p9  ;;  %s244_s11 = int_to_ptr.vmem [resolvable:$true] %s243_s11 }
  0x44   : > { %p1044_p1 = pneg %p1681_p12  ;;  %s289_s3 = sand.u32 1, %s1420_s29  }
  0x45   : > { %s915_s1 = sshll.u32 %s289_s3, 6  ;;  %s916_s21 = sshll.u32 %s1444_s12, 6 }
  0x46   : > { %p1698_p3 = pnand %p1044_p1, %p1896_p8  ;;  %s291_s4 = scalar_lea.vmem [#allocation8], %s915_s1 }
  0x47   : > { %s297_s23 = sshll.u32 %s291_s4, 4  ;;  %s1925_s0 = sld [smem:[#allocation26_spill]]  ;;  %s298_s23 = int_to_ptr.vmem [resolvable:$true] %s297_s23 }
  0x48   : > { %p1248_p6 = pneg %p1698_p3  ;;  %s1257_s7 = scalar_lea.vmem %s244_s11, 1024 }
  0x49   : > { %p1258_p9 = scmp.ne.s32.totalorder %s244_s11, %s1257_s7  ;;  %p1265_p10 = scmp.lt.s32.totalorder %s244_s11, %s244_s11 }
  0x4a   : > { %p1266_p1 = scmp.lt.s32.totalorder %s1257_s7, %s1257_s7 }
  0x4b   : > { %p1260_p4 = pnand %p1258_p9, %p1248_p6 }
  0x4c   : > { %p1267_p8 = por %p1266_p1, %p1265_p10 }
  0x4d   : > { %s1706_s13 = scalar_lea.hbm %s1925_s0, %s916_s21  ;;  %p1261_p2 = pneg %p1260_p4 }
  0x4f   : > { %p1268_p7 = pnand %p1267_p8, %p1261_p2 }
  0x51   : > { %1271 = shalt.err (!%p1268_p7)
}
  0x52   : > { %s1926_s3 = smov 4   ;;  %s1927_s4 = smov 64  }
  0x53   : > { %s1928_s0 = sld [smem:[#allocation22_spill]]  ;;  %p1274_p5 = pneg %p1689_p0 }
  0x54   : > { %s1285_s21 = scalar_lea.vmem %s298_s23, 1024  ;;  %s1458_s7 = smov [#allocation8]  }
  0x55   : > { %p1286_p6 = scmp.ne.s32.totalorder %s298_s23, %s1285_s21  ;;  %s1290_s10 = sshll.u32 %s1458_s7, 4  ;;  %s1291_s10 = int_to_ptr.vmem [resolvable:$false] %s1290_s10 }
  0x56   : > { %s1292_s12 = scalar_lea.vmem %s1291_s10, 2048  ;;  %p1293_p8 = scmp.lt.s32.totalorder %s298_s23, %s1291_s10 }
  0x57   : > { %p1288_p9 = pnand %p1286_p6, %p1274_p5  ;;  %p1294_p7 = scmp.lt.s32.totalorder %s1292_s12, %s1285_s21 }
  0x59   : > { %1047 = dma.hbm_to_vmem [thread:$0]  (!%p1698_p3), %s1928_s0, 1024, %s244_s11, [#allocation7], %s1927_s4, %s1927_s4, %s1926_s3  }
  0x5a   : > { %p1289_p4 = pneg %p1288_p9  ;;  %p1295_p2 = por %p1294_p7, %p1293_p8 }
  0x5c   : > { %p1296_p10 = pnand %p1295_p2, %p1289_p4 }
  0x5e   : > { %1299 = shalt.err (!%p1296_p10)
}
  0x5f   : > { %s1459_s20 = smov 192   ;;  %315 = sbr.rel (%p1681_p12) target bundleno = 938 (0x3aa), region = 48 }
  0x60   : > { %1054 = dma.hbm_to_vmem [thread:$0]  (!%p1689_p0), %s1706_s13, 1024, %s298_s23, %s1621_s17, %s1459_s20, %s1927_s4, %s1926_s3  }
  0x61   : > { %s317_s11 = sand.u32 (!%p1681_p12), 1, %s1632_s18   ;;  %s319_s1 = sand.u32 (!%p1681_p12), 1, %s1428_s8  }
  0x62   : > { %s1730_s12 = sshll.u32 (!%p1681_p12), %s319_s1, 4  ;;  %s318_s6 = scalar_lea.sflag (!%p1681_p12), [#allocation4], %s317_s11 }
  0x63   : > { %s321_s0 = scalar_lea.vmem (!%p1681_p12), [#allocation3], %s1730_s12 }
  0x64   : > { %1383 = dma.done.wait (%p1643_p11), %s318_s6, 256  }
  0x65   : > { %1385 = vsyncadd (%p1643_p11), %s318_s6, 4294967040  ;;  %p1929_p5 = scmp.eq.s32.totalorder %s1632_s18, 0 }
  0x67   : > { %1387 = dma.done.wait (%p1929_p5), [#allocation7], 1024   ;;  %p1930_p12 = pmov %p1929_p5 }
  0x68   : > { %s332_s13 = sand.u32 1, %s1416_s28  }
  0x69   : > { %1389 = vsyncadd (%p1930_p12), [#allocation7], 4294966272  ;;  %s920_s17 = sshll.u32 %s332_s13, 6 }
  0x6a   : > { %s1742_s22 = scalar_lea.vmem [#allocation8], %s920_s17 }
  0x6b   : > { %1391 = dma.done.wait (%p1662_p13), %s318_s6, 1024  }
  0x6c   : > { %1393 = vsyncadd (%p1662_p13), %s318_s6, 4294966272  ;;  %s1931_s16 = sld [smem:[#allocation14_spill]]  ;;  %s370_s2 = sand.u32 1, %s1404_s25  }
  0x6d   : > { %s921_s18 = sshll.u32 %s370_s2, 5  ;;  %s1932_s21 = sld [smem:[#allocation27_spill]] }
  0x6e   : > { %s1759_s10 = scalar_lea.vmem [#allocation9], %s921_s18 }
  0x72   : > { %p374_p11 = scmp.lt.s32.totalorder %s1931_s16, 2  ;;  %p922_p0 = scmp.ne.s32.totalorder %s1931_s16, 0 }
  0x73   : > { %s1933_s11 = sld [smem:[#allocation23_spill]] (!%p922_p0) }
  0x74   : > { %s1753_s23 = scalar_select %p374_p11, %s1931_s16, 2 }
  0x75   : > { %382 = sbr.rel (%p922_p0) target bundleno = 689 (0x2b1), region = 64  ;;  %s1934_s6 = sld [smem:[#allocation24_spill]] (!%p922_p0) }
  0x76   : > { %s376_s7 = scalar_lea.vmem %s1932_s21, %s1753_s23  ;;  %s1935_s17 = sld [smem:[#allocation25_spill]] (!%p922_p0) }
  0x7a   : > { %v1182_v0 = vld [vmem:[#allocation6 + $0x38] sm:$0xff]   ;;  %v1183_v1 = vld [vmem:[#allocation6 + $0x30] sm:$0xff]   ;;  %v1184_v2 = vld [vmem:[#allocation6 + $0x28] sm:$0xff]  }
  0x7b   : > { %993 = vmatprep.subr.bf16.mxu0 %v1182_v0  ;;  %v1185_v3 = vld [vmem:[#allocation6 + $0x20] sm:$0xff]   ;;  %v1186_v5 = vld [vmem:[#allocation6 + $0x18] sm:$0xff]   ;;  %v1187_v6 = vld [vmem:[#allocation6 + $0x10] sm:$0xff]  }
  0x7c   : > { %994 = vmatpush3.bf16.msra.mxu0 %v1182_v0  ;;  %v1190_v4 = vld [vmem:[%s321_s0] sm:$0xff]   ;;  %v1188_v7 = vld [vmem:[#allocation6 + $0x8] sm:$0xff]  }
  0x7d   : > { %995 = vmatprep.subr.bf16.mxu0 %v1183_v1  ;;  %1009 = vmatprep.mubr.bf16.mxu0 %v1190_v4  ;;  %v1189_v8 = vld [vmem:[#allocation6] sm:$0xff]   ;;  %v1191_v9 = vld [vmem:[%s321_s0 + $0x8] sm:$0xff]   ;;  %v923_v10 = vld [vmem:[%s1933_s11] ss:$0 sm:$0xff] }
  0x80   : > { %996 = vmatpush3.bf16.msra.mxu0 %v1183_v1 }
  0x81   : > { %997 = vmatprep.subr.bf16.mxu0 %v1184_v2 }
  0x84   : > { %998 = vmatpush3.bf16.msra.mxu0 %v1184_v2 }
  0x85   : > { %999 = vmatprep.subr.bf16.mxu0 %v1185_v3 }
  0x88   : > { %1000 = vmatpush3.bf16.msra.mxu0 %v1185_v3 }
  0x89   : > { %1001 = vmatprep.subr.bf16.mxu0 %v1186_v5 }
  0x8c   : > { %1002 = vmatpush3.bf16.msra.mxu0 %v1186_v5  ;;  %v934_v5 = vld [vmem:[%s1934_s6] ss:$0 sm:$0xff] }
  0x8d   : > { %1003 = vmatprep.subr.bf16.mxu0 %v1187_v6 }
  0x90   : > { %1004 = vmatpush3.bf16.msra.mxu0 %v1187_v6 }
  0x91   : > { %1005 = vmatprep.subr.bf16.mxu0 %v1188_v7 }
  0x94   : > { %1006 = vmatpush3.bf16.msra.mxu0 %v1188_v7 }
  0x95   : > { %1007 = vmatprep.subr.bf16.mxu0 %v1189_v8 }
  0x98   : > { %1008 = vmatpush3.bf16.msra.mxu0 %v1189_v8 }
  0x9b   : > { %1010 = vmatmul.mubr.bf16.vlgmr.msra.gmra.mxu0 %v1191_v9 }
 0x15b   : > { %v1011_v11 = vpop.f32.mrf.mxu0 }
 0x15c   : > { %v513_v12 = vadd.f32 %v1011_v11, %v923_v10 }
 0x15d   : > { %v504_v13 = vpop.f32.mrf.mxu0 }
 0x15e   : > { %v525_v14 = vmul.f32 0.70710856, %v513_v12  ;;  %v505_v15 = vadd.f32 %v923_v10, %v504_v13  ;;  %v521_v24 = vmul.f32 0.5, %v513_v12 }
 0x15f   : > { %v1012_v16 = vpop.f32.mrf.mxu0 }
 0x160   : > { %1192 = verf.f32 %v525_v14  ;;  %v523_v17 = vmul.f32 0.70710856, %v505_v15  ;;  %v516_v18 = vadd.f32 %v1012_v16, %v923_v10  ;;  %v519_v27 = vmul.f32 0.5, %v505_v15 }
 0x161   : > { %v507_v19 = vpop.f32.mrf.mxu0 }
 0x162   : > { %1194 = verf.f32 %v523_v17  ;;  %v526_v20 = vmul.f32 0.70710856, %v516_v18  ;;  %v508_v21 = vadd.f32 %v923_v10, %v507_v19  ;;  %v522_v31 = vmul.f32 0.5, %v516_v18  ;;  %v935_v10 = vld [vmem:[%s1935_s17] ss:$0 sm:$0xff] }
 0x164   : > { %1196 = verf.f32 %v526_v20  ;;  %v524_v22 = vmul.f32 0.70710856, %v508_v21  ;;  %v520_v35 = vmul.f32 0.5, %v508_v21 }
 0x166   : > { %1198 = verf.f32 %v524_v22 }
 0x16d   : > { %v1193_v23 = vpop.eup %1192 }
 0x16e   : > { %v533_v25 = vadd.f32 1.0, %v1193_v23 }
 0x16f   : > { %v1195_v26 = vpop.eup %1194 }
 0x170   : > { %v537_v28 = vmul.f32 %v533_v25, %v521_v24  ;;  %v531_v29 = vadd.f32 1.0, %v1195_v26 }
 0x171   : > { %v1197_v30 = vpop.eup %1196 }
 0x172   : > { %543 = vadd.xlane.f32.xlu1 %v537_v28  ;;  %v535_v32 = vmul.f32 %v531_v29, %v519_v27  ;;  %v534_v33 = vadd.f32 1.0, %v1197_v30 }
 0x173   : > { %v1199_v34 = vpop.eup %1198 }
 0x174   : > { %539 = vadd.xlane.f32.xlu0 %v535_v32  ;;  %v538_v36 = vmul.f32 %v534_v33, %v522_v31  ;;  %v532_v37 = vadd.f32 1.0, %v1199_v34 }
 0x176   : > { %545 = vadd.xlane.f32.xlu1 %v538_v36  ;;  %v536_v38 = vmul.f32 %v532_v37, %v520_v35 }
 0x178   : > { %541 = vadd.xlane.f32.xlu0 %v536_v38 }
 0x1fb   : > { %v544_v39 = vpop.xlane.xlu1 %543 }
 0x1fc   : > { %v550_v41 = vmul.f32 0.0078125, %v544_v39 }
 0x1fd   : > { %v540_v40 = vpop.xlane.xlu0 %539 }
 0x1fe   : > { %v548_v42 = vmul.f32 0.0078125, %v540_v40  ;;  %v554_v46 = vsub.f32 %v537_v28, %v550_v41 }
 0x1ff   : > { %v546_v43 = vpop.xlane.xlu1 %545 }
 0x200   : > { %v552_v44 = vsub.f32 %v535_v32, %v548_v42  ;;  %v551_v47 = vmul.f32 0.0078125, %v546_v43  ;;  %v558_v52 = vmul.f32 %v554_v46, %v554_v46 }
 0x201   : > { %v542_v45 = vpop.xlane.xlu0 %541 }
 0x202   : > { %v549_v48 = vmul.f32 0.0078125, %v542_v45  ;;  %v556_v49 = vmul.f32 %v552_v44, %v552_v44  ;;  %v555_v51 = vsub.f32 %v538_v36, %v551_v47 }
 0x204   : > { %v553_v50 = vsub.f32 %v536_v38, %v549_v48  ;;  %560 = vadd.xlane.f32.xlu0 %v556_v49  ;;  %v559_v54 = vmul.f32 %v555_v51, %v555_v51 }
 0x206   : > { %v557_v53 = vmul.f32 %v553_v50, %v553_v50 }
 0x208   : > { %564 = vadd.xlane.f32.xlu0 %v558_v52  ;;  %562 = vadd.xlane.f32.xlu1 %v557_v53 }
 0x20c   : > { %566 = vadd.xlane.f32.xlu1 %v559_v54 }
 0x28d   : > { %v561_v55 = vpop.xlane.xlu0 %560 }
 0x28e   : > { %v568_v56 = vmul.f32 0.0078125, %v561_v55 }
 0x290   : > { %v572_v57 = vadd.f32 1e-12, %v568_v56 }
 0x291   : > { %v563_v58 = vpop.xlane.xlu1 %562  ;;  %v565_v59 = vpop.xlane.xlu0 %564 }
 0x292   : > { %1200 = vrsqrt.f32 %v572_v57  ;;  %v569_v60 = vmul.f32 0.0078125, %v563_v58  ;;  %v570_v61 = vmul.f32 0.0078125, %v565_v59 }
 0x294   : > { %v573_v62 = vadd.f32 1e-12, %v569_v60  ;;  %v574_v63 = vadd.f32 1e-12, %v570_v61 }
 0x295   : > { %v567_v0 = vpop.xlane.xlu1 %566 }
 0x296   : > { %1202 = vrsqrt.f32 %v573_v62  ;;  %v571_v1 = vmul.f32 0.0078125, %v567_v0 }
 0x297   : > { %1204 = vrsqrt.f32 %v574_v63 }
 0x298   : > { %v575_v2 = vadd.f32 1e-12, %v571_v1 }
 0x29a   : > { %1206 = vrsqrt.f32 %v575_v2 }
 0x29f   : > { %v1201_v3 = vpop.eup %1200 }
 0x2a0   : > { %v580_v4 = vmul.f32 %v1201_v3, %v552_v44 }
 0x2a2   : > { %v591_v8 = vmul.f32 %v934_v5, %v580_v4 }
 0x2a3   : > { %v1203_v6 = vpop.eup %1202 }
 0x2a4   : > { %v1205_v7 = vpop.eup %1204  ;;  %v581_v9 = vmul.f32 %v1203_v6, %v553_v50  ;;  %v602_v14 = vadd.f32 %v935_v10, %v591_v8 }
 0x2a5   : > { %v582_v11 = vmul.f32 %v1205_v7, %v554_v46 }
 0x2a6   : > { %v592_v12 = vmul.f32 %v934_v5, %v581_v9 }
 0x2a7   : > { %v1207_v13 = vpop.eup %1206  ;;  %v593_v16 = vmul.f32 %v934_v5, %v582_v11 }
 0x2a8   : > { %v603_v15 = vadd.f32 %v935_v10, %v592_v12  ;;  %v583_v17 = vmul.f32 %v1207_v13, %v555_v51 }
 0x2a9   : > { %v604_v20 = vadd.f32 %v935_v10, %v593_v16 }
 0x2aa   : > { %v965_v18 = vpack.c.bf16 %v603_v15, %v602_v14  ;;  %v594_v19 = vmul.f32 %v934_v5, %v583_v17 }
 0x2ac   : > { %966 = vst [vmem:[#allocation2] sm:$0xff] %v965_v18   ;;  %v605_v21 = vadd.f32 %v935_v10, %v594_v19 }
 0x2ae   : > { %v970_v22 = vpack.c.bf16 %v605_v21, %v604_v20 }
 0x2b0   : > { %972 = vst [vmem:[#allocation2 + $0x8] sm:$0xff] %v970_v22  }
 0x2b1 PF: > { %v1208_v23 = vld [vmem:[%s1742_s22 + $0x38] sm:$0xff]   ;;  %v1209_v24 = vld [vmem:[%s1742_s22 + $0x30] sm:$0xff]   ;;  %v1210_v25 = vld [vmem:[%s1742_s22 + $0x28] sm:$0xff]   ;;  %s1936_s16 = sld [smem:[#allocation15_spill]]  ;;  %s782_s11 = sshll.u32 %s1759_s10, 4  ;;  %s1798_s11 = int_to_ptr.vmem [resolvable:$true] %s782_s11 }
 0x2b2   : > { %1013 = vmatprep.subr.bf16.mxu0 %v1208_v23  ;;  %v1211_v26 = vld [vmem:[%s1742_s22 + $0x20] sm:$0xff]   ;;  %v1212_v28 = vld [vmem:[%s1742_s22 + $0x18] sm:$0xff]   ;;  %s1937_s18 = sld [smem:[#allocation14_spill]]  ;;  %v1213_v29 = vld [vmem:[%s1742_s22 + $0x10] sm:$0xff]   ;;  %s1300_s0 = scalar_lea.vmem %s1798_s11, 512 }
 0x2b3   : > { %1014 = vmatpush3.bf16.msra.mxu0 %v1208_v23  ;;  %v1216_v27 = vld [vmem:[#allocation2] sm:$0xff]   ;;  %v1214_v30 = vld [vmem:[%s1742_s22 + $0x8] sm:$0xff]   ;;  %v1215_v31 = vld [vmem:[%s1742_s22] sm:$0xff]   ;;  %s1939_s6 = sld [smem:[#allocation28_spill]]  ;;  %p1301_p13 = scmp.ne.s32.totalorder %s1798_s11, %s1300_s0 }
 0x2b4   : > { %1015 = vmatprep.subr.bf16.mxu0 %v1209_v24  ;;  %1029 = vmatprep.mubr.bf16.mxu0 %v1216_v27  ;;  %v940_v33 = vld [vmem:[%s376_s7] ss:$0 sm:$0xff]  ;;  %s1804_s7 = scalar_lea.sflag [#allocation5], %s370_s2  ;;  %p1940_p3 = scmp.ne.s32.totalorder %s1920_s27, 0 }
 0x2b5   : > { %s1460_s13 = smov [#allocation9]  }
 0x2b6   : > { %p1302_p1 = pnand %p1301_p13, %p1940_p3  ;;  %s1304_s17 = sshll.u32 %s1460_s13, 4  ;;  %s1305_s17 = int_to_ptr.vmem [resolvable:$false] %s1304_s17 }
 0x2b7   : > { %1016 = vmatpush3.bf16.msra.mxu0 %v1209_v24  ;;  %v1217_v32 = vld [vmem:[#allocation2 + $0x8] sm:$0xff]   ;;  %s1033_s3 = smul.u32 12, %s1936_s16  ;;  %s1306_s16 = scalar_lea.vmem %s1305_s17, 1024 }
 0x2b8   : > { %1017 = vmatprep.subr.bf16.mxu0 %v1210_v25  ;;  %p1303_p6 = pneg %p1302_p1  ;;  %p1307_p9 = scmp.lt.s32.totalorder %s1798_s11, %s1305_s17 }
 0x2b9   : > { %s779_s20 = sadd.s32 %s1937_s18, %s1033_s3  ;;  %p1308_p4 = scmp.lt.s32.totalorder %s1306_s16, %s1300_s0 }
 0x2ba   : > { %s954_s22 = sshll.u32 %s779_s20, 7 }
 0x2bb   : > { %1018 = vmatpush3.bf16.msra.mxu0 %v1210_v25  ;;  %s1796_s23 = scalar_lea.hbm %s1939_s6, %s954_s22  ;;  %p1309_p8 = por %p1308_p4, %p1307_p9 }
 0x2bc   : > { %1019 = vmatprep.subr.bf16.mxu0 %v1211_v26 }
 0x2bd   : > { %p1310_p7 = pnand %p1309_p8, %p1303_p6 }
 0x2bf   : > { %1020 = vmatpush3.bf16.msra.mxu0 %v1211_v26 }
 0x2c0   : > { %1021 = vmatprep.subr.bf16.mxu0 %v1212_v28 }
 0x2c3   : > { %1022 = vmatpush3.bf16.msra.mxu0 %v1212_v28 }
 0x2c4   : > { %1023 = vmatprep.subr.bf16.mxu0 %v1213_v29 }
 0x2c7   : > { %1024 = vmatpush3.bf16.msra.mxu0 %v1213_v29 }
 0x2c8   : > { %1025 = vmatprep.subr.bf16.mxu0 %v1214_v30 }
 0x2cb   : > { %1026 = vmatpush3.bf16.msra.mxu0 %v1214_v30 }
 0x2cc   : > { %1027 = vmatprep.subr.bf16.mxu0 %v1215_v31 }
 0x2cf   : > { %1028 = vmatpush3.bf16.msra.mxu0 %v1215_v31 }
 0x2d2   : > { %1030 = vmatmul.mubr.bf16.vlgmr.msra.gmra.mxu0 %v1217_v32 }
 0x392   : > { %v1031_v34 = vpop.f32.mrf.mxu0 }
 0x393   : > { %v756_v35 = vadd.f32 %v1031_v34, %v940_v33 }
 0x394   : > { %v747_v36 = vpop.f32.mrf.mxu0 }
 0x395   : > { %764 = vst [vmem:[%s1759_s10 + $0x10] sm:$0xff] %v756_v35  ;;  %v748_v37 = vadd.f32 %v940_v33, %v747_v36 }
 0x396   : > { %v1032_v38 = vpop.f32.mrf.mxu0 }
 0x397   : > { %762 = vst [vmem:[%s1759_s10] sm:$0xff] %v748_v37  ;;  %v759_v39 = vadd.f32 %v1032_v38, %v940_v33 }
 0x398   : > { %v750_v40 = vpop.f32.mrf.mxu0 }
 0x399   : > { %765 = vst [vmem:[%s1759_s10 + $0x18] sm:$0xff] %v759_v39  ;;  %v751_v41 = vadd.f32 %v940_v33, %v750_v40 }
 0x39b   : > { %763 = vst [vmem:[%s1759_s10 + $0x8] sm:$0xff] %v751_v41 }
 0x39c   : > { %1313 = shalt.err (!%p1310_p7)
}
 0x39d   : > { %s1314_s2 = scalar_lea.hbm %s1796_s23, 512  ;;  %s1318_s3 = scalar_lea.hbm %s1939_s6, 4608 }
 0x39e   : > { %p1315_p2 = scmp.ne.s32.totalorder %s1796_s23, %s1314_s2  ;;  %p1319_p12 = scmp.lt.s32.totalorder %s1796_s23, %s1939_s6 }
 0x39f   : > { %p1320_p11 = scmp.lt.s32.totalorder %s1318_s3, %s1314_s2 }
 0x3a0   : > { %p1316_p10 = pnand %p1315_p2, %p1940_p3 }
 0x3a1   : > { %p1321_p0 = por %p1320_p11, %p1319_p12 }
 0x3a2   : > { %p1317_p5 = pneg %p1316_p10 }
 0x3a4   : > { %p1322_p13 = pnand %p1321_p0, %p1317_p5 }
 0x3a6   : > { %1325 = shalt.err (!%p1322_p13)
}
 0x3a7   : > { %s1461_s30 = smov 128   ;;  %s1462_s20 = smov 384  }
 0x3a8   : > { %s1463_s22 = smov 8  }
 0x3a9   : > { %1042 = dma.vmem_to_hbm [thread:$0]  (%p1940_p3), %s1798_s11, 512, %s1796_s23, %s1804_s7, %s1461_s30, %s1462_s20, %s1463_s22  }
 0x3aa PF: > { %p1062_p1 = scmp.ge.s32.totalorder %s1452_s14, 2  ;;  %s797_s1 = sand.u32 1, %s1400_s24  }
 0x3ab   : > { %p1941_p6 = scmp.ne.s32.totalorder %s1921_s19, 0  ;;  %s798_s12 = scalar_lea.sflag [#allocation5], %s797_s1 }
 0x3ad   : > { %p1056_p9 = pnand %p1062_p1, %p1941_p6 }
 0x3af   : > { %p1057_p4 = pneg %p1056_p9 }
 0x3b1   : > { %1395 = dma.done.wait (%p1057_p4), %s798_s12, 512  }
 0x3b2   : > { %1397 = vsyncadd (%p1057_p4), %s798_s12, 4294966784  ;;  %s24_s14 = sadd.s32 1, %s1452_s14   ;;  %s1943_s19 = sld [smem:[#allocation20_spill]] }
 0x3b3   : > { %p1832_p8 = scmp.ge.s32.totalorder %s24_s14, 11   ;;  %s1944_s10 = sld [smem:[#allocation16_spill]] }
 0x3b4   : > { %s1945_s11 = sld [smem:[#allocation17_spill]]  ;;  %s1948_s24 = smov %s1404_s25 }
 0x3b5   : > { %s1946_s12 = sld [smem:[#allocation18_spill]]  ;;  %s1949_s25 = smov %s1408_s26 }
 0x3b6   : > { %s1947_s13 = sld [smem:[#allocation19_spill]]  ;;  %s1950_s26 = smov %s1606_s15 }
 0x3b7   : > { %s1951_s27 = smov %s1416_s28  ;;  %s1952_s28 = smov %s1420_s29 }
 0x3b8   : > { %s1953_s29 = smov %s1652_s5  ;;  %s1954_s30 = smov %s1428_s8 }
 0x3b9   : > { %s1955_s8 = smov %s1432_s9  ;;  %s1956_s9 = smov %s1943_s19 }
 0x3ba   :  { %23 = sbr.rel (!%p1832_p8) target bundleno = 20 (0x14), region = 115 }
 0x3bf   :  { %803 = vsyncpa [#allocation4], 1 }
 0x3c0   :  { %805 = vsyncpa [#allocation4 + $0x1], 1 }
 0x3c1   :  { %806 = vsyncpa [#allocation7], 1 }
 0x3c2   :  { %807 = vsyncpa [#allocation5], 1 }
 0x3c3   :  { %809 = vsyncpa [#allocation5 + $0x1], 1 }

</bundles_post_ra>
